<compile_context>
chip_gen: v6e
topology: v6e:2x2x1
jax: 0.10.0
libtpu: 0.0.40
codegen_flags: <defaults>
</compile_context>

<pallas_src>
import functools

import jax
import jax.numpy as jnp
import numpy as np
from jax import lax
from jax.experimental import pallas as pl
from jax.experimental.pallas import tpu as pltpu

_F0 = 128  # lane-aligned flat offset where the image interior starts in the act slab


def _cnn_fused_kernel(x_ref, *refs, H, W, Cmax, n_layers):
    """Fused CNN forward for one image (one grid step).

    x_ref   : (1, Cin, H*W)  raw flattened NCHW input block
    refs    : w_0, b_0, ..., w_{L-1}, b_{L-1}, o_ref, act_ref
      w_l   : (Cout_l, 9*Cmax)  tap-major / channel-minor packed weights
      b_l   : (Cout_l, 1)
      o_ref : (1, Cout_final, H*W)
      act_ref : (Cmax, _F0 + H*W + W + 1)  flat padded-activation VMEM scratch
                (interior at lanes [_F0, _F0+H*W); one zero halo row above/below)
    """
    wb = refs[:2 * n_layers]
    o_ref = refs[2 * n_layers]
    act_ref = refs[2 * n_layers + 1]
    HW = H * W

    # Zero the slab each grid step (it is only ~4 vregs): keeps the halo rows, the
    # front/back pads and the unused channel tail at zero for every layer.  Not
    # gated on program_id because with "parallel" semantics each core owns its
    # own scratch instance.
    act_ref[...] = jnp.zeros(act_ref.shape, act_ref.dtype)

    # Drop the input image into the slab: (Cin, HW) at lane-aligned offset _F0.
    cin = x_ref.shape[1]
    act_ref[0:cin, _F0:_F0 + HW] = x_ref[0].astype(jnp.float32)

    # Horizontal zero-pad masks for the flat layout (hoisted; reused by all layers).
    # A flat shift by dx-1 wraps across row edges; dx=0 taps must see zero at w==0,
    # dx=2 taps at w==W-1.
    col_in_row = lax.broadcasted_iota(jnp.int32, (1, HW), 1) % W
    not_left = col_in_row != 0
    not_right = col_in_row != (W - 1)

    for l in range(n_layers):  # statically unrolled over conv layers
        w_ref, b_ref = wb[2 * l], wb[2 * l + 1]
        cout = w_ref.shape[0]
        last = l == n_layers - 1
        hidden = (l != 0) and (not last)

        # Build the 9-tap stack in-register: nine lane-shifted (Cmax, HW) windows
        # concatenated along sublanes -> (9*Cmax, HW).  dy shifts are whole-row
        # flat shifts (halo rows are zero); dx shifts need the edge masks above.
        wins = []
        for k in range(9):
            dy, dx = divmod(k, 3)
            start = _F0 + (dy - 1) * W + (dx - 1)  # static lane offset
            win = act_ref[:, start:start + HW]
            if dx == 0:
                win = jnp.where(not_left, win, 0.0)
            elif dx == 2:
                win = jnp.where(not_right, win, 0.0)
            wins.append(win)
        col = jnp.concatenate(wins, axis=0)  # (9*Cmax, HW), lane-dense

        # One MXU matmul per layer: (Cout, 9*Cmax) x (9*Cmax, HW) -> (Cout, HW).
        y = jnp.dot(w_ref[...], col, preferred_element_type=jnp.float32)
        y = y + b_ref[...]  # (Cout, 1) broadcast along lanes

        if hidden:
            # InstanceNorm2d defaults: affine=False, eps=1e-5, biased variance,
            # per-(batch, channel) stats over H*W.  Centered two-pass form.
            mean = jnp.mean(y, axis=1, keepdims=True)
            d = y - mean
            var = jnp.mean(d * d, axis=1, keepdims=True)
            y = d * lax.rsqrt(var + 1e-5)

        if last:
            # Lane-dense (Cout, 256) store straight to the output block.
            o_ref[0] = jax.nn.sigmoid(y).astype(o_ref.dtype)
        else:
            if l + 1 < n_layers - 1:
                # The next hidden block starts with ReLU; each activation has
                # exactly one consumer, so fold the ReLU into this write-back.
                y = jnp.maximum(y, 0.0)
            # Aligned, unmasked 256-lane interior write-back.
            act_ref[0:cout, _F0:_F0 + HW] = y


def cnn_forward(x_nchw, params):
    """Pallas implementation of CNN.forward. Input/output layout: NCHW (PyTorch)."""
    layers = [params["input"], *params["hidden"], params["output"]]
    n_layers = len(layers)

    B, Cin, H, W = x_nchw.shape
    HW = H * W
    hidden_c = layers[0][0].shape[0]
    cout_final = layers[-1][0].shape[0]
    Cmax = max(Cin, hidden_c)          # common padded channel width inside the kernel
    LA = _F0 + HW + W + 1              # flat act-slab length (front pad + image + tail)

    # Metadata-only reshape of the contiguous NCHW input -> (B, Cin, H*W);
    # no transpose / pad / extra HBM pass in the wrapper.
    x_flat = x_nchw.reshape(B, Cin, HW)

    flat_inputs = [x_flat]
    in_specs = [pl.BlockSpec((1, Cin, HW), lambda i: (i, 0, 0))]

    # Weights: OIHW -> (Cout, 9*Cmax), tap-major / channel-minor, input-channel
    # axis zero-padded to Cmax so every layer shares K = 9*Cmax.
    for (w, b) in layers:
        co, ci = w.shape[0], w.shape[1]
        wk = jnp.transpose(w, (0, 2, 3, 1))                        # (co, 3, 3, ci)
        wk = jnp.pad(wk, ((0, 0), (0, 0), (0, 0), (0, Cmax - ci)))
        wk = wk.reshape(co, 9 * Cmax)
        flat_inputs += [wk, b.reshape(co, 1)]
        in_specs += [pl.BlockSpec((co, 9 * Cmax), lambda i: (0, 0)),
                     pl.BlockSpec((co, 1), lambda i: (0, 0))]

    kernel = functools.partial(_cnn_fused_kernel, H=H, W=W, Cmax=Cmax,
                               n_layers=n_layers)

    out = pl.pallas_call(
        kernel,
        out_shape=jax.ShapeDtypeStruct((B, cout_final, HW), x_nchw.dtype),
        grid_spec=pltpu.PrefetchScalarGridSpec(
            num_scalar_prefetch=0,
            grid=(B,),
            in_specs=in_specs,
            out_specs=pl.BlockSpec((1, cout_final, HW), lambda i: (i, 0, 0)),
            scratch_shapes=[
                pltpu.VMEM((Cmax, LA), jnp.float32),  # flat padded activations
            ],
        ),
        # TODO(synk): if H/W/C grow, add a row-tiled grid axis (1-row halo) so the
        # per-step activation/col footprint stays well under v7x's 64 MiB VMEM.
        compiler_params=pltpu.CompilerParams(
            dimension_semantics=("parallel",),
            vmem_limit_bytes=32 * 1024 * 1024,
        ),
    )(*flat_inputs)

    # Contiguous (B, Cout, H*W) -> NCHW is a free reshape (no transpose op).
    return out.reshape(B, cout_final, H, W)


def init_cnn_params(key, input_channels, output_channels, hidden_c, hidden_layers):
    """Deterministic PyTorch-style (kaiming-uniform-ish) init for all conv layers."""
    def conv_init(k, cout, cin):
        k1, k2 = jax.random.split(k)
        bound = 1.0 / np.sqrt(cin * 9)
        w = jax.random.uniform(k1, (cout, cin, 3, 3), jnp.float32, -bound, bound)
        b = jax.random.uniform(k2, (cout,), jnp.float32, -bound, bound)
        return w, b

    keys = jax.random.split(key, hidden_layers + 1)
    return {
        "input": conv_init(keys[0], hidden_c, input_channels),
        "hidden": [conv_init(keys[i + 1], hidden_c, hidden_c)
                   for i in range(hidden_layers - 1)],
        "output": conv_init(keys[hidden_layers], output_channels, hidden_c),
    }


def cnn_forward_ref(x, params):
    """Pure-JAX reference (NCHW), mirroring the PyTorch forward exactly."""
    def conv(x, w, b):
        y = lax.conv_general_dilated(
            x, w, window_strides=(1, 1), padding="SAME",
            dimension_numbers=("NCHW", "OIHW", "NCHW"))
        return y + b[None, :, None, None]

    w, b = params["input"]
    x = conv(x, w, b)
    for (w, b) in params["hidden"]:
        x = jnp.maximum(x, 0.0)
        x = conv(x, w, b)
        mean = jnp.mean(x, axis=(2, 3), keepdims=True)
        var = jnp.mean((x - mean) ** 2, axis=(2, 3), keepdims=True)
        x = (x - mean) * lax.rsqrt(var + 1e-5)
    w, b = params["output"]
    return jax.nn.sigmoid(conv(x, w, b))


if __name__ == "__main__":
    B, Cin, H, W = 2, 4, 16, 16
    output_channels, hidden_c, hidden_layers = 3, 8, 3

    key = jax.random.PRNGKey(0)
    kx, kp = jax.random.split(key)
    x = jax.random.normal(kx, (B, Cin, H, W), dtype=jnp.float32)
    params = init_cnn_params(kp, Cin, output_channels, hidden_c, hidden_layers)

    out = cnn_forward(x, params)
    out = jax.block_until_ready(out)
    assert out.shape == (B, output_channels, H, W)

    ref = cnn_forward_ref(x, params)
    np.testing.assert_allclose(np.asarray(out), np.asarray(ref), rtol=2e-3, atol=2e-3)

    print("KERNEL_OK")
</pallas_src>

<mosaic_0001>
module attributes {stable_mosaic.version = 11 : i64} {
  func.func @_cnn_fused_kernel(%arg0: i32, %arg1: memref<1x4x256xf32, #tpu.memory_space<vmem>>, %arg2: memref<8x72xf32, #tpu.memory_space<vmem>>, %arg3: memref<8x1xf32, #tpu.memory_space<vmem>>, %arg4: memref<8x72xf32, #tpu.memory_space<vmem>>, %arg5: memref<8x1xf32, #tpu.memory_space<vmem>>, %arg6: memref<8x72xf32, #tpu.memory_space<vmem>>, %arg7: memref<8x1xf32, #tpu.memory_space<vmem>>, %arg8: memref<3x72xf32, #tpu.memory_space<vmem>>, %arg9: memref<3x1xf32, #tpu.memory_space<vmem>>, %arg10: memref<1x3x256xf32, #tpu.memory_space<vmem>>, %arg11: memref<8x401xf32, #tpu.memory_space<vmem>>) attributes {dimension_semantics = [#tpu.dimension_semantics<parallel>], iteration_bounds = array<i64: 2>, scalar_prefetch = 0 : i64, scratch_operands = 1 : i64, tpu.core_type = #tpu.core_type<tc>, window_params = [{transform_indices = @transform_0, window_bounds = array<i64: 1, 4, 256>}, {pipeline_mode = #tpu.pipeline_mode<synchronous>, transform_indices = @transform_1, window_bounds = array<i64: 8, 72>}, {pipeline_mode = #tpu.pipeline_mode<synchronous>, transform_indices = @transform_2, window_bounds = array<i64: 8, 1>}, {pipeline_mode = #tpu.pipeline_mode<synchronous>, transform_indices = @transform_3, window_bounds = array<i64: 8, 72>}, {pipeline_mode = #tpu.pipeline_mode<synchronous>, transform_indices = @transform_4, window_bounds = array<i64: 8, 1>}, {pipeline_mode = #tpu.pipeline_mode<synchronous>, transform_indices = @transform_5, window_bounds = array<i64: 8, 72>}, {pipeline_mode = #tpu.pipeline_mode<synchronous>, transform_indices = @transform_6, window_bounds = array<i64: 8, 1>}, {pipeline_mode = #tpu.pipeline_mode<synchronous>, transform_indices = @transform_7, window_bounds = array<i64: 3, 72>}, {pipeline_mode = #tpu.pipeline_mode<synchronous>, transform_indices = @transform_8, window_bounds = array<i64: 3, 1>}, {transform_indices = @transform_9, window_bounds = array<i64: 1, 3, 256>}]} {
    %cst = arith.constant 0.000000e+00 : f32
    %0 = vector.broadcast %cst : f32 to vector<8x401xf32>
    %c0 = arith.constant 0 : index
    %c0_0 = arith.constant 0 : index
    %1 = vector.load %arg11[%c0, %c0_0] : memref<8x401xf32, #tpu.memory_space<vmem>>, vector<8x401xf32>
    tpu.vector_store %arg11[%c0, %c0_0], %0 {strides = array<i32>} : memref<8x401xf32, #tpu.memory_space<vmem>>, vector<8x401xf32>,
    %c0_1 = arith.constant 0 : index
    %c0_2 = arith.constant 0 : index
    %c0_3 = arith.constant 0 : index
    %2 = vector.load %arg1[%c0_1, %c0_2, %c0_3] : memref<1x4x256xf32, #tpu.memory_space<vmem>>, vector<1x4x256xf32>
    %3 = vector.shape_cast %2 : vector<1x4x256xf32> to vector<4x256xf32>
    %c0_4 = arith.constant 0 : index
    %c128 = arith.constant 128 : index
    %4 = vector.load %arg11[%c0_4, %c128] : memref<8x401xf32, #tpu.memory_space<vmem>>, vector<4x256xf32>
    tpu.vector_store %arg11[%c0_4, %c128], %3 {strides = array<i32>} : memref<8x401xf32, #tpu.memory_space<vmem>>, vector<4x256xf32>,
    %5 = tpu.iota {dimensions = array<i32: 1>} : vector<1x256xi32>
    %c16_i32 = arith.constant 16 : i32
    %c0_i32 = arith.constant 0 : i32
    %6 = arith.cmpi eq, %c16_i32, %c0_i32 : i32
    %c1_i32 = arith.constant 1 : i32
    %7 = arith.select %6, %c1_i32, %c16_i32 : i32
    %8 = vector.broadcast %7 : i32 to vector<1x256xi32>
    %9 = arith.remsi %5, %8 : vector<1x256xi32>
    %c0_i32_5 = arith.constant 0 : i32
    %10 = vector.broadcast %c0_i32_5 : i32 to vector<1x256xi32>
    %11 = arith.cmpi ne, %9, %10 : vector<1x256xi32>
    %c0_i32_6 = arith.constant 0 : i32
    %12 = vector.broadcast %c0_i32_6 : i32 to vector<1x256xi32>
    %13 = arith.cmpi slt, %9, %12 : vector<1x256xi32>
    %c0_i32_7 = arith.constant 0 : i32
    %14 = arith.cmpi slt, %7, %c0_i32_7 : i32
    %15 = vector.broadcast %14 : i1 to vector<1x256xi1>
    %16 = vector.broadcast %15 : vector<1x256xi1> to vector<1x256xi1>
    %17 = arith.xori %13, %16 : vector<1x256xi1>
    %18 = arith.andi %17, %11 : vector<1x256xi1>
    %19 = vector.broadcast %7 : i32 to vector<1x256xi32>
    %20 = arith.addi %9, %19 : vector<1x256xi32>
    %21 = arith.select %18, %20, %9 : vector<1x256xi1>, vector<1x256xi32>
    %c0_i32_8 = arith.constant 0 : i32
    %22 = vector.broadcast %c0_i32_8 : i32 to vector<1x256xi32>
    %23 = arith.cmpi ne, %21, %22 : vector<1x256xi32>
    %c15_i32 = arith.constant 15 : i32
    %24 = vector.broadcast %c15_i32 : i32 to vector<1x256xi32>
    %25 = arith.cmpi ne, %21, %24 : vector<1x256xi32>
    %c0_9 = arith.constant 0 : index
    %c111 = arith.constant 111 : index
    %26 = vector.load %arg11[%c0_9, %c111] : memref<8x401xf32, #tpu.memory_space<vmem>>, vector<8x256xf32>
    %cst_10 = arith.constant 0.000000e+00 : f32
    %27 = vector.shape_cast %23 : vector<1x256xi1> to vector<1x256xi1>
    %28 = vector.broadcast %27 : vector<1x256xi1> to vector<8x256xi1>
    %29 = vector.broadcast %cst_10 : f32 to vector<8x256xf32>
    %30 = arith.select %28, %26, %29 : vector<8x256xi1>, vector<8x256xf32>
    %c0_11 = arith.constant 0 : index
    %c112 = arith.constant 112 : index
    %31 = vector.load %arg11[%c0_11, %c112] : memref<8x401xf32, #tpu.memory_space<vmem>>, vector<8x256xf32>
    %c0_12 = arith.constant 0 : index
    %c113 = arith.constant 113 : index
    %32 = vector.load %arg11[%c0_12, %c113] : memref<8x401xf32, #tpu.memory_space<vmem>>, vector<8x256xf32>
    %cst_13 = arith.constant 0.000000e+00 : f32
    %33 = vector.shape_cast %25 : vector<1x256xi1> to vector<1x256xi1>
    %34 = vector.broadcast %33 : vector<1x256xi1> to vector<8x256xi1>
    %35 = vector.broadcast %cst_13 : f32 to vector<8x256xf32>
    %36 = arith.select %34, %32, %35 : vector<8x256xi1>, vector<8x256xf32>
    %c0_14 = arith.constant 0 : index
    %c127 = arith.constant 127 : index
    %37 = vector.load %arg11[%c0_14, %c127] : memref<8x401xf32, #tpu.memory_space<vmem>>, vector<8x256xf32>
    %cst_15 = arith.constant 0.000000e+00 : f32
    %38 = vector.shape_cast %23 : vector<1x256xi1> to vector<1x256xi1>
    %39 = vector.broadcast %38 : vector<1x256xi1> to vector<8x256xi1>
    %40 = vector.broadcast %cst_15 : f32 to vector<8x256xf32>
    %41 = arith.select %39, %37, %40 : vector<8x256xi1>, vector<8x256xf32>
    %c0_16 = arith.constant 0 : index
    %c128_17 = arith.constant 128 : index
    %42 = vector.load %arg11[%c0_16, %c128_17] : memref<8x401xf32, #tpu.memory_space<vmem>>, vector<8x256xf32>
    %c0_18 = arith.constant 0 : index
    %c129 = arith.constant 129 : index
    %43 = vector.load %arg11[%c0_18, %c129] : memref<8x401xf32, #tpu.memory_space<vmem>>, vector<8x256xf32>
    %cst_19 = arith.constant 0.000000e+00 : f32
    %44 = vector.shape_cast %25 : vector<1x256xi1> to vector<1x256xi1>
    %45 = vector.broadcast %44 : vector<1x256xi1> to vector<8x256xi1>
    %46 = vector.broadcast %cst_19 : f32 to vector<8x256xf32>
    %47 = arith.select %45, %43, %46 : vector<8x256xi1>, vector<8x256xf32>
    %c0_20 = arith.constant 0 : index
    %c143 = arith.constant 143 : index
    %48 = vector.load %arg11[%c0_20, %c143] : memref<8x401xf32, #tpu.memory_space<vmem>>, vector<8x256xf32>
    %cst_21 = arith.constant 0.000000e+00 : f32
    %49 = vector.shape_cast %23 : vector<1x256xi1> to vector<1x256xi1>
    %50 = vector.broadcast %49 : vector<1x256xi1> to vector<8x256xi1>
    %51 = vector.broadcast %cst_21 : f32 to vector<8x256xf32>
    %52 = arith.select %50, %48, %51 : vector<8x256xi1>, vector<8x256xf32>
    %c0_22 = arith.constant 0 : index
    %c144 = arith.constant 144 : index
    %53 = vector.load %arg11[%c0_22, %c144] : memref<8x401xf32, #tpu.memory_space<vmem>>, vector<8x256xf32>
    %c0_23 = arith.constant 0 : index
    %c145 = arith.constant 145 : index
    %54 = vector.load %arg11[%c0_23, %c145] : memref<8x401xf32, #tpu.memory_space<vmem>>, vector<8x256xf32>
    %cst_24 = arith.constant 0.000000e+00 : f32
    %55 = vector.shape_cast %25 : vector<1x256xi1> to vector<1x256xi1>
    %56 = vector.broadcast %55 : vector<1x256xi1> to vector<8x256xi1>
    %57 = vector.broadcast %cst_24 : f32 to vector<8x256xf32>
    %58 = arith.select %56, %54, %57 : vector<8x256xi1>, vector<8x256xf32>
    %59 = tpu.concatenate %30, %31, %36, %41, %42, %47, %52, %53, %58 in 0 : vector<8x256xf32>, vector<8x256xf32>, vector<8x256xf32>, vector<8x256xf32>, vector<8x256xf32>, vector<8x256xf32>, vector<8x256xf32>, vector<8x256xf32>, vector<8x256xf32> -> vector<72x256xf32>
    %c0_25 = arith.constant 0 : index
    %c0_26 = arith.constant 0 : index
    %60 = vector.load %arg2[%c0_25, %c0_26] : memref<8x72xf32, #tpu.memory_space<vmem>>, vector<8x72xf32>
    %cst_27 = arith.constant dense<0.000000e+00> : vector<8x256xf32>
    %61 = tpu.matmul %60, %59, %cst_27 {dimension_numbers = #tpu.dot_dimension_numbers<[1], [0], [0], [1], [0, 0, 1, 1], [], []>} : vector<8x72xf32>, vector<72x256xf32>, vector<8x256xf32> -> vector<8x256xf32>
    %c0_28 = arith.constant 0 : index
    %c0_29 = arith.constant 0 : index
    %62 = vector.load %arg3[%c0_28, %c0_29] : memref<8x1xf32, #tpu.memory_space<vmem>>, vector<8x1xf32>
    %63 = vector.broadcast %62 : vector<8x1xf32> to vector<8x256xf32>
    %64 = arith.addf %61, %63 : vector<8x256xf32>
    %cst_30 = arith.constant 0.000000e+00 : f32
    %65 = vector.broadcast %cst_30 : f32 to vector<8x256xf32>
    %66 = arith.maximumf %64, %65 : vector<8x256xf32>
    %c0_31 = arith.constant 0 : index
    %c128_32 = arith.constant 128 : index
    %67 = vector.load %arg11[%c0_31, %c128_32] : memref<8x401xf32, #tpu.memory_space<vmem>>, vector<8x256xf32>
    tpu.vector_store %arg11[%c0_31, %c128_32], %66 {strides = array<i32>} : memref<8x401xf32, #tpu.memory_space<vmem>>, vector<8x256xf32>,
    %c0_33 = arith.constant 0 : index
    %c111_34 = arith.constant 111 : index
    %68 = vector.load %arg11[%c0_33, %c111_34] : memref<8x401xf32, #tpu.memory_space<vmem>>, vector<8x256xf32>
    %cst_35 = arith.constant 0.000000e+00 : f32
    %69 = vector.shape_cast %23 : vector<1x256xi1> to vector<1x256xi1>
    %70 = vector.broadcast %69 : vector<1x256xi1> to vector<8x256xi1>
    %71 = vector.broadcast %cst_35 : f32 to vector<8x256xf32>
    %72 = arith.select %70, %68, %71 : vector<8x256xi1>, vector<8x256xf32>
    %c0_36 = arith.constant 0 : index
    %c112_37 = arith.constant 112 : index
    %73 = vector.load %arg11[%c0_36, %c112_37] : memref<8x401xf32, #tpu.memory_space<vmem>>, vector<8x256xf32>
    %c0_38 = arith.constant 0 : index
    %c113_39 = arith.constant 113 : index
    %74 = vector.load %arg11[%c0_38, %c113_39] : memref<8x401xf32, #tpu.memory_space<vmem>>, vector<8x256xf32>
    %cst_40 = arith.constant 0.000000e+00 : f32
    %75 = vector.shape_cast %25 : vector<1x256xi1> to vector<1x256xi1>
    %76 = vector.broadcast %75 : vector<1x256xi1> to vector<8x256xi1>
    %77 = vector.broadcast %cst_40 : f32 to vector<8x256xf32>
    %78 = arith.select %76, %74, %77 : vector<8x256xi1>, vector<8x256xf32>
    %c0_41 = arith.constant 0 : index
    %c127_42 = arith.constant 127 : index
    %79 = vector.load %arg11[%c0_41, %c127_42] : memref<8x401xf32, #tpu.memory_space<vmem>>, vector<8x256xf32>
    %cst_43 = arith.constant 0.000000e+00 : f32
    %80 = vector.shape_cast %23 : vector<1x256xi1> to vector<1x256xi1>
    %81 = vector.broadcast %80 : vector<1x256xi1> to vector<8x256xi1>
    %82 = vector.broadcast %cst_43 : f32 to vector<8x256xf32>
    %83 = arith.select %81, %79, %82 : vector<8x256xi1>, vector<8x256xf32>
    %c0_44 = arith.constant 0 : index
    %c128_45 = arith.constant 128 : index
    %84 = vector.load %arg11[%c0_44, %c128_45] : memref<8x401xf32, #tpu.memory_space<vmem>>, vector<8x256xf32>
    %c0_46 = arith.constant 0 : index
    %c129_47 = arith.constant 129 : index
    %85 = vector.load %arg11[%c0_46, %c129_47] : memref<8x401xf32, #tpu.memory_space<vmem>>, vector<8x256xf32>
    %cst_48 = arith.constant 0.000000e+00 : f32
    %86 = vector.shape_cast %25 : vector<1x256xi1> to vector<1x256xi1>
    %87 = vector.broadcast %86 : vector<1x256xi1> to vector<8x256xi1>
    %88 = vector.broadcast %cst_48 : f32 to vector<8x256xf32>
    %89 = arith.select %87, %85, %88 : vector<8x256xi1>, vector<8x256xf32>
    %c0_49 = arith.constant 0 : index
    %c143_50 = arith.constant 143 : index
    %90 = vector.load %arg11[%c0_49, %c143_50] : memref<8x401xf32, #tpu.memory_space<vmem>>, vector<8x256xf32>
    %cst_51 = arith.constant 0.000000e+00 : f32
    %91 = vector.shape_cast %23 : vector<1x256xi1> to vector<1x256xi1>
    %92 = vector.broadcast %91 : vector<1x256xi1> to vector<8x256xi1>
    %93 = vector.broadcast %cst_51 : f32 to vector<8x256xf32>
    %94 = arith.select %92, %90, %93 : vector<8x256xi1>, vector<8x256xf32>
    %c0_52 = arith.constant 0 : index
    %c144_53 = arith.constant 144 : index
    %95 = vector.load %arg11[%c0_52, %c144_53] : memref<8x401xf32, #tpu.memory_space<vmem>>, vector<8x256xf32>
    %c0_54 = arith.constant 0 : index
    %c145_55 = arith.constant 145 : index
    %96 = vector.load %arg11[%c0_54, %c145_55] : memref<8x401xf32, #tpu.memory_space<vmem>>, vector<8x256xf32>
    %cst_56 = arith.constant 0.000000e+00 : f32
    %97 = vector.shape_cast %25 : vector<1x256xi1> to vector<1x256xi1>
    %98 = vector.broadcast %97 : vector<1x256xi1> to vector<8x256xi1>
    %99 = vector.broadcast %cst_56 : f32 to vector<8x256xf32>
    %100 = arith.select %98, %96, %99 : vector<8x256xi1>, vector<8x256xf32>
    %101 = tpu.concatenate %72, %73, %78, %83, %84, %89, %94, %95, %100 in 0 : vector<8x256xf32>, vector<8x256xf32>, vector<8x256xf32>, vector<8x256xf32>, vector<8x256xf32>, vector<8x256xf32>, vector<8x256xf32>, vector<8x256xf32>, vector<8x256xf32> -> vector<72x256xf32>
    %c0_57 = arith.constant 0 : index
    %c0_58 = arith.constant 0 : index
    %102 = vector.load %arg4[%c0_57, %c0_58] : memref<8x72xf32, #tpu.memory_space<vmem>>, vector<8x72xf32>
    %cst_59 = arith.constant dense<0.000000e+00> : vector<8x256xf32>
    %103 = tpu.matmul %102, %101, %cst_59 {dimension_numbers = #tpu.dot_dimension_numbers<[1], [0], [0], [1], [0, 0, 1, 1], [], []>} : vector<8x72xf32>, vector<72x256xf32>, vector<8x256xf32> -> vector<8x256xf32>
    %c0_60 = arith.constant 0 : index
    %c0_61 = arith.constant 0 : index
    %104 = vector.load %arg5[%c0_60, %c0_61] : memref<8x1xf32, #tpu.memory_space<vmem>>, vector<8x1xf32>
    %105 = vector.broadcast %104 : vector<8x1xf32> to vector<8x256xf32>
    %106 = arith.addf %103, %105 : vector<8x256xf32>
    %cst_62 = arith.constant dense<0.000000e+00> : vector<8xf32>
    %107 = vector.multi_reduction <add>, %106, %cst_62 [1] : vector<8x256xf32> to vector<8xf32>
    %108 = vector.shape_cast %107 : vector<8xf32> to vector<8x1xf32>
    %cst_63 = arith.constant 2.560000e+02 : f32
    %109 = vector.broadcast %cst_63 : f32 to vector<8x1xf32>
    %110 = arith.divf %108, %109 : vector<8x1xf32>
    %111 = vector.broadcast %110 : vector<8x1xf32> to vector<8x256xf32>
    %112 = arith.subf %106, %111 : vector<8x256xf32>
    %113 = arith.mulf %112, %112 : vector<8x256xf32>
    %cst_64 = arith.constant dense<0.000000e+00> : vector<8xf32>
    %114 = vector.multi_reduction <add>, %113, %cst_64 [1] : vector<8x256xf32> to vector<8xf32>
    %115 = vector.shape_cast %114 : vector<8xf32> to vector<8x1xf32>
    %cst_65 = arith.constant 2.560000e+02 : f32
    %116 = vector.broadcast %cst_65 : f32 to vector<8x1xf32>
    %117 = arith.divf %115, %116 : vector<8x1xf32>
    %cst_66 = arith.constant 9.99999974E-6 : f32
    %118 = vector.broadcast %cst_66 : f32 to vector<8x1xf32>
    %119 = arith.addf %117, %118 : vector<8x1xf32>
    %120 = math.rsqrt %119 : vector<8x1xf32>
    %121 = vector.broadcast %120 : vector<8x1xf32> to vector<8x256xf32>
    %122 = arith.mulf %112, %121 : vector<8x256xf32>
    %cst_67 = arith.constant 0.000000e+00 : f32
    %123 = vector.broadcast %cst_67 : f32 to vector<8x256xf32>
    %124 = arith.maximumf %122, %123 : vector<8x256xf32>
    %c0_68 = arith.constant 0 : index
    %c128_69 = arith.constant 128 : index
    %125 = vector.load %arg11[%c0_68, %c128_69] : memref<8x401xf32, #tpu.memory_space<vmem>>, vector<8x256xf32>
    tpu.vector_store %arg11[%c0_68, %c128_69], %124 {strides = array<i32>} : memref<8x401xf32, #tpu.memory_space<vmem>>, vector<8x256xf32>,
    %c0_70 = arith.constant 0 : index
    %c111_71 = arith.constant 111 : index
    %126 = vector.load %arg11[%c0_70, %c111_71] : memref<8x401xf32, #tpu.memory_space<vmem>>, vector<8x256xf32>
    %cst_72 = arith.constant 0.000000e+00 : f32
    %127 = vector.shape_cast %23 : vector<1x256xi1> to vector<1x256xi1>
    %128 = vector.broadcast %127 : vector<1x256xi1> to vector<8x256xi1>
    %129 = vector.broadcast %cst_72 : f32 to vector<8x256xf32>
    %130 = arith.select %128, %126, %129 : vector<8x256xi1>, vector<8x256xf32>
    %c0_73 = arith.constant 0 : index
    %c112_74 = arith.constant 112 : index
    %131 = vector.load %arg11[%c0_73, %c112_74] : memref<8x401xf32, #tpu.memory_space<vmem>>, vector<8x256xf32>
    %c0_75 = arith.constant 0 : index
    %c113_76 = arith.constant 113 : index
    %132 = vector.load %arg11[%c0_75, %c113_76] : memref<8x401xf32, #tpu.memory_space<vmem>>, vector<8x256xf32>
    %cst_77 = arith.constant 0.000000e+00 : f32
    %133 = vector.shape_cast %25 : vector<1x256xi1> to vector<1x256xi1>
    %134 = vector.broadcast %133 : vector<1x256xi1> to vector<8x256xi1>
    %135 = vector.broadcast %cst_77 : f32 to vector<8x256xf32>
    %136 = arith.select %134, %132, %135 : vector<8x256xi1>, vector<8x256xf32>
    %c0_78 = arith.constant 0 : index
    %c127_79 = arith.constant 127 : index
    %137 = vector.load %arg11[%c0_78, %c127_79] : memref<8x401xf32, #tpu.memory_space<vmem>>, vector<8x256xf32>
    %cst_80 = arith.constant 0.000000e+00 : f32
    %138 = vector.shape_cast %23 : vector<1x256xi1> to vector<1x256xi1>
    %139 = vector.broadcast %138 : vector<1x256xi1> to vector<8x256xi1>
    %140 = vector.broadcast %cst_80 : f32 to vector<8x256xf32>
    %141 = arith.select %139, %137, %140 : vector<8x256xi1>, vector<8x256xf32>
    %c0_81 = arith.constant 0 : index
    %c128_82 = arith.constant 128 : index
    %142 = vector.load %arg11[%c0_81, %c128_82] : memref<8x401xf32, #tpu.memory_space<vmem>>, vector<8x256xf32>
    %c0_83 = arith.constant 0 : index
    %c129_84 = arith.constant 129 : index
    %143 = vector.load %arg11[%c0_83, %c129_84] : memref<8x401xf32, #tpu.memory_space<vmem>>, vector<8x256xf32>
    %cst_85 = arith.constant 0.000000e+00 : f32
    %144 = vector.shape_cast %25 : vector<1x256xi1> to vector<1x256xi1>
    %145 = vector.broadcast %144 : vector<1x256xi1> to vector<8x256xi1>
    %146 = vector.broadcast %cst_85 : f32 to vector<8x256xf32>
    %147 = arith.select %145, %143, %146 : vector<8x256xi1>, vector<8x256xf32>
    %c0_86 = arith.constant 0 : index
    %c143_87 = arith.constant 143 : index
    %148 = vector.load %arg11[%c0_86, %c143_87] : memref<8x401xf32, #tpu.memory_space<vmem>>, vector<8x256xf32>
    %cst_88 = arith.constant 0.000000e+00 : f32
    %149 = vector.shape_cast %23 : vector<1x256xi1> to vector<1x256xi1>
    %150 = vector.broadcast %149 : vector<1x256xi1> to vector<8x256xi1>
    %151 = vector.broadcast %cst_88 : f32 to vector<8x256xf32>
    %152 = arith.select %150, %148, %151 : vector<8x256xi1>, vector<8x256xf32>
    %c0_89 = arith.constant 0 : index
    %c144_90 = arith.constant 144 : index
    %153 = vector.load %arg11[%c0_89, %c144_90] : memref<8x401xf32, #tpu.memory_space<vmem>>, vector<8x256xf32>
    %c0_91 = arith.constant 0 : index
    %c145_92 = arith.constant 145 : index
    %154 = vector.load %arg11[%c0_91, %c145_92] : memref<8x401xf32, #tpu.memory_space<vmem>>, vector<8x256xf32>
    %cst_93 = arith.constant 0.000000e+00 : f32
    %155 = vector.shape_cast %25 : vector<1x256xi1> to vector<1x256xi1>
    %156 = vector.broadcast %155 : vector<1x256xi1> to vector<8x256xi1>
    %157 = vector.broadcast %cst_93 : f32 to vector<8x256xf32>
    %158 = arith.select %156, %154, %157 : vector<8x256xi1>, vector<8x256xf32>
    %159 = tpu.concatenate %130, %131, %136, %141, %142, %147, %152, %153, %158 in 0 : vector<8x256xf32>, vector<8x256xf32>, vector<8x256xf32>, vector<8x256xf32>, vector<8x256xf32>, vector<8x256xf32>, vector<8x256xf32>, vector<8x256xf32>, vector<8x256xf32> -> vector<72x256xf32>
    %c0_94 = arith.constant 0 : index
    %c0_95 = arith.constant 0 : index
    %160 = vector.load %arg6[%c0_94, %c0_95] : memref<8x72xf32, #tpu.memory_space<vmem>>, vector<8x72xf32>
    %cst_96 = arith.constant dense<0.000000e+00> : vector<8x256xf32>
    %161 = tpu.matmul %160, %159, %cst_96 {dimension_numbers = #tpu.dot_dimension_numbers<[1], [0], [0], [1], [0, 0, 1, 1], [], []>} : vector<8x72xf32>, vector<72x256xf32>, vector<8x256xf32> -> vector<8x256xf32>
    %c0_97 = arith.constant 0 : index
    %c0_98 = arith.constant 0 : index
    %162 = vector.load %arg7[%c0_97, %c0_98] : memref<8x1xf32, #tpu.memory_space<vmem>>, vector<8x1xf32>
    %163 = vector.broadcast %162 : vector<8x1xf32> to vector<8x256xf32>
    %164 = arith.addf %161, %163 : vector<8x256xf32>
    %cst_99 = arith.constant dense<0.000000e+00> : vector<8xf32>
    %165 = vector.multi_reduction <add>, %164, %cst_99 [1] : vector<8x256xf32> to vector<8xf32>
    %166 = vector.shape_cast %165 : vector<8xf32> to vector<8x1xf32>
    %cst_100 = arith.constant 2.560000e+02 : f32
    %167 = vector.broadcast %cst_100 : f32 to vector<8x1xf32>
    %168 = arith.divf %166, %167 : vector<8x1xf32>
    %169 = vector.broadcast %168 : vector<8x1xf32> to vector<8x256xf32>
    %170 = arith.subf %164, %169 : vector<8x256xf32>
    %171 = arith.mulf %170, %170 : vector<8x256xf32>
    %cst_101 = arith.constant dense<0.000000e+00> : vector<8xf32>
    %172 = vector.multi_reduction <add>, %171, %cst_101 [1] : vector<8x256xf32> to vector<8xf32>
    %173 = vector.shape_cast %172 : vector<8xf32> to vector<8x1xf32>
    %cst_102 = arith.constant 2.560000e+02 : f32
    %174 = vector.broadcast %cst_102 : f32 to vector<8x1xf32>
    %175 = arith.divf %173, %174 : vector<8x1xf32>
    %cst_103 = arith.constant 9.99999974E-6 : f32
    %176 = vector.broadcast %cst_103 : f32 to vector<8x1xf32>
    %177 = arith.addf %175, %176 : vector<8x1xf32>
    %178 = math.rsqrt %177 : vector<8x1xf32>
    %179 = vector.broadcast %178 : vector<8x1xf32> to vector<8x256xf32>
    %180 = arith.mulf %170, %179 : vector<8x256xf32>
    %c0_104 = arith.constant 0 : index
    %c128_105 = arith.constant 128 : index
    %181 = vector.load %arg11[%c0_104, %c128_105] : memref<8x401xf32, #tpu.memory_space<vmem>>, vector<8x256xf32>
    tpu.vector_store %arg11[%c0_104, %c128_105], %180 {strides = array<i32>} : memref<8x401xf32, #tpu.memory_space<vmem>>, vector<8x256xf32>,
    %c0_106 = arith.constant 0 : index
    %c111_107 = arith.constant 111 : index
    %182 = vector.load %arg11[%c0_106, %c111_107] : memref<8x401xf32, #tpu.memory_space<vmem>>, vector<8x256xf32>
    %cst_108 = arith.constant 0.000000e+00 : f32
    %183 = vector.shape_cast %23 : vector<1x256xi1> to vector<1x256xi1>
    %184 = vector.broadcast %183 : vector<1x256xi1> to vector<8x256xi1>
    %185 = vector.broadcast %cst_108 : f32 to vector<8x256xf32>
    %186 = arith.select %184, %182, %185 : vector<8x256xi1>, vector<8x256xf32>
    %c0_109 = arith.constant 0 : index
    %c112_110 = arith.constant 112 : index
    %187 = vector.load %arg11[%c0_109, %c112_110] : memref<8x401xf32, #tpu.memory_space<vmem>>, vector<8x256xf32>
    %c0_111 = arith.constant 0 : index
    %c113_112 = arith.constant 113 : index
    %188 = vector.load %arg11[%c0_111, %c113_112] : memref<8x401xf32, #tpu.memory_space<vmem>>, vector<8x256xf32>
    %cst_113 = arith.constant 0.000000e+00 : f32
    %189 = vector.shape_cast %25 : vector<1x256xi1> to vector<1x256xi1>
    %190 = vector.broadcast %189 : vector<1x256xi1> to vector<8x256xi1>
    %191 = vector.broadcast %cst_113 : f32 to vector<8x256xf32>
    %192 = arith.select %190, %188, %191 : vector<8x256xi1>, vector<8x256xf32>
    %c0_114 = arith.constant 0 : index
    %c127_115 = arith.constant 127 : index
    %193 = vector.load %arg11[%c0_114, %c127_115] : memref<8x401xf32, #tpu.memory_space<vmem>>, vector<8x256xf32>
    %cst_116 = arith.constant 0.000000e+00 : f32
    %194 = vector.shape_cast %23 : vector<1x256xi1> to vector<1x256xi1>
    %195 = vector.broadcast %194 : vector<1x256xi1> to vector<8x256xi1>
    %196 = vector.broadcast %cst_116 : f32 to vector<8x256xf32>
    %197 = arith.select %195, %193, %196 : vector<8x256xi1>, vector<8x256xf32>
    %c0_117 = arith.constant 0 : index
    %c128_118 = arith.constant 128 : index
    %198 = vector.load %arg11[%c0_117, %c128_118] : memref<8x401xf32, #tpu.memory_space<vmem>>, vector<8x256xf32>
    %c0_119 = arith.constant 0 : index
    %c129_120 = arith.constant 129 : index
    %199 = vector.load %arg11[%c0_119, %c129_120] : memref<8x401xf32, #tpu.memory_space<vmem>>, vector<8x256xf32>
    %cst_121 = arith.constant 0.000000e+00 : f32
    %200 = vector.shape_cast %25 : vector<1x256xi1> to vector<1x256xi1>
    %201 = vector.broadcast %200 : vector<1x256xi1> to vector<8x256xi1>
    %202 = vector.broadcast %cst_121 : f32 to vector<8x256xf32>
    %203 = arith.select %201, %199, %202 : vector<8x256xi1>, vector<8x256xf32>
    %c0_122 = arith.constant 0 : index
    %c143_123 = arith.constant 143 : index
    %204 = vector.load %arg11[%c0_122, %c143_123] : memref<8x401xf32, #tpu.memory_space<vmem>>, vector<8x256xf32>
    %cst_124 = arith.constant 0.000000e+00 : f32
    %205 = vector.shape_cast %23 : vector<1x256xi1> to vector<1x256xi1>
    %206 = vector.broadcast %205 : vector<1x256xi1> to vector<8x256xi1>
    %207 = vector.broadcast %cst_124 : f32 to vector<8x256xf32>
    %208 = arith.select %206, %204, %207 : vector<8x256xi1>, vector<8x256xf32>
    %c0_125 = arith.constant 0 : index
    %c144_126 = arith.constant 144 : index
    %209 = vector.load %arg11[%c0_125, %c144_126] : memref<8x401xf32, #tpu.memory_space<vmem>>, vector<8x256xf32>
    %c0_127 = arith.constant 0 : index
    %c145_128 = arith.constant 145 : index
    %210 = vector.load %arg11[%c0_127, %c145_128] : memref<8x401xf32, #tpu.memory_space<vmem>>, vector<8x256xf32>
    %cst_129 = arith.constant 0.000000e+00 : f32
    %211 = vector.shape_cast %25 : vector<1x256xi1> to vector<1x256xi1>
    %212 = vector.broadcast %211 : vector<1x256xi1> to vector<8x256xi1>
    %213 = vector.broadcast %cst_129 : f32 to vector<8x256xf32>
    %214 = arith.select %212, %210, %213 : vector<8x256xi1>, vector<8x256xf32>
    %215 = tpu.concatenate %186, %187, %192, %197, %198, %203, %208, %209, %214 in 0 : vector<8x256xf32>, vector<8x256xf32>, vector<8x256xf32>, vector<8x256xf32>, vector<8x256xf32>, vector<8x256xf32>, vector<8x256xf32>, vector<8x256xf32>, vector<8x256xf32> -> vector<72x256xf32>
    %c0_130 = arith.constant 0 : index
    %c0_131 = arith.constant 0 : index
    %216 = vector.load %arg8[%c0_130, %c0_131] : memref<3x72xf32, #tpu.memory_space<vmem>>, vector<3x72xf32>
    %cst_132 = arith.constant dense<0.000000e+00> : vector<3x256xf32>
    %217 = tpu.matmul %216, %215, %cst_132 {dimension_numbers = #tpu.dot_dimension_numbers<[1], [0], [0], [1], [0, 0, 1, 1], [], []>} : vector<3x72xf32>, vector<72x256xf32>, vector<3x256xf32> -> vector<3x256xf32>
    %c0_133 = arith.constant 0 : index
    %c0_134 = arith.constant 0 : index
    %218 = vector.load %arg9[%c0_133, %c0_134] : memref<3x1xf32, #tpu.memory_space<vmem>>, vector<3x1xf32>
    %219 = vector.broadcast %218 : vector<3x1xf32> to vector<3x256xf32>
    %220 = arith.addf %217, %219 : vector<3x256xf32>
    %221 = arith.negf %220 : vector<3x256xf32>
    %222 = math.exp %221 : vector<3x256xf32>
    %cst_135 = arith.constant 1.000000e+00 : f32
    %223 = vector.broadcast %cst_135 : f32 to vector<3x256xf32>
    %224 = arith.addf %223, %222 : vector<3x256xf32>
    %225 = arith.divf %223, %224 : vector<3x256xf32>
    %c0_136 = arith.constant 0 : index
    %c0_137 = arith.constant 0 : index
    %c0_138 = arith.constant 0 : index
    %226 = vector.load %arg10[%c0_136, %c0_137, %c0_138] : memref<1x3x256xf32, #tpu.memory_space<vmem>>, vector<1x3x256xf32>
    %227 = vector.shape_cast %226 : vector<1x3x256xf32> to vector<3x256xf32>
    %228 = vector.shape_cast %225 : vector<3x256xf32> to vector<1x3x256xf32>
    tpu.vector_store %arg10[%c0_136, %c0_137, %c0_138], %228 {strides = array<i32>} : memref<1x3x256xf32, #tpu.memory_space<vmem>>, vector<1x3x256xf32>,
    return
  }
  func.func @transform_0(%arg0: i32) -> (i32, i32, i32) {
    %c0_i32 = arith.constant 0 : i32
    %c0_i32_0 = arith.constant 0 : i32
    %c0_i32_1 = arith.constant 0 : i32
    return %arg0, %c0_i32, %c0_i32_0 : i32, i32, i32
  }
  func.func @transform_1(%arg0: i32) -> (i32, i32) {
    %c0_i32 = arith.constant 0 : i32
    %c0_i32_0 = arith.constant 0 : i32
    %c0_i32_1 = arith.constant 0 : i32
    return %c0_i32, %c0_i32_0 : i32, i32
  }
  func.func @transform_2(%arg0: i32) -> (i32, i32) {
    %c0_i32 = arith.constant 0 : i32
    %c0_i32_0 = arith.constant 0 : i32
    %c0_i32_1 = arith.constant 0 : i32
    return %c0_i32, %c0_i32_0 : i32, i32
  }
  func.func @transform_3(%arg0: i32) -> (i32, i32) {
    %c0_i32 = arith.constant 0 : i32
    %c0_i32_0 = arith.constant 0 : i32
    %c0_i32_1 = arith.constant 0 : i32
    return %c0_i32, %c0_i32_0 : i32, i32
  }
  func.func @transform_4(%arg0: i32) -> (i32, i32) {
    %c0_i32 = arith.constant 0 : i32
    %c0_i32_0 = arith.constant 0 : i32
    %c0_i32_1 = arith.constant 0 : i32
    return %c0_i32, %c0_i32_0 : i32, i32
  }
  func.func @transform_5(%arg0: i32) -> (i32, i32) {
    %c0_i32 = arith.constant 0 : i32
    %c0_i32_0 = arith.constant 0 : i32
    %c0_i32_1 = arith.constant 0 : i32
    return %c0_i32, %c0_i32_0 : i32, i32
  }
  func.func @transform_6(%arg0: i32) -> (i32, i32) {
    %c0_i32 = arith.constant 0 : i32
    %c0_i32_0 = arith.constant 0 : i32
    %c0_i32_1 = arith.constant 0 : i32
    return %c0_i32, %c0_i32_0 : i32, i32
  }
  func.func @transform_7(%arg0: i32) -> (i32, i32) {
    %c0_i32 = arith.constant 0 : i32
    %c0_i32_0 = arith.constant 0 : i32
    %c0_i32_1 = arith.constant 0 : i32
    return %c0_i32, %c0_i32_0 : i32, i32
  }
  func.func @transform_8(%arg0: i32) -> (i32, i32) {
    %c0_i32 = arith.constant 0 : i32
    %c0_i32_0 = arith.constant 0 : i32
    %c0_i32_1 = arith.constant 0 : i32
    return %c0_i32, %c0_i32_0 : i32, i32
  }
  func.func @transform_9(%arg0: i32) -> (i32, i32, i32) {
    %c0_i32 = arith.constant 0 : i32
    %c0_i32_0 = arith.constant 0 : i32
    %c0_i32_1 = arith.constant 0 : i32
    return %arg0, %c0_i32, %c0_i32_0 : i32, i32, i32
  }
}

</mosaic_0001>

<bundles_post_ra>
// kernel: tpu_custom_call.1
= control target key start
LH: loop header
LB: loop body
LE: loop exit
PB: predicated region body
PF: predicated region fallthrough
CT: control target
= control target key end

     0   :  { %s1398_s30 = smov 0   ;;  %s1797_s0 = inlined_call_operand.vmem [shape: f32[2,4,256], index: 0, kind: input, shape index: {}]   ;;  %s1798_s1 = inlined_call_operand.vmem [shape: f32[8,72], index: 1, kind: input, shape index: {}]   ;;  %s1799_s2 = inlined_call_operand.vmem [shape: f32[8,1], index: 2, kind: input, shape index: {}]   ;;  %s1800_s3 = inlined_call_operand.vmem [shape: f32[8,72], index: 3, kind: input, shape index: {}]   ;;  %s1801_s4 = inlined_call_operand.vmem [shape: f32[8,1], index: 4, kind: input, shape index: {}]   ;;  %s1802_s5 = inlined_call_operand.vmem [shape: f32[8,72], index: 5, kind: input, shape index: {}]   ;;  %s1803_s6 = inlined_call_operand.vmem [shape: f32[8,1], index: 6, kind: input, shape index: {}]   ;;  %s1804_s7 = inlined_call_operand.vmem [shape: f32[3,72], index: 7, kind: input, shape index: {}]   ;;  %s1805_s8 = inlined_call_operand.vmem [shape: f32[3,1], index: 8, kind: input, shape index: {}]   ;;  %s1806_s9 = inlined_call_operand.vmem [shape: f32[2,3,256], index: 9, kind: output, shape index: {}]  }
   0x1 LB: > { %s1230_s10 = sadd.s32 4294967295, %s1336_s30   ;;  %p1234_p0 = scmp.ge.s32.totalorder %s1336_s30, 1  ;;  %s1336_s30 = sphi %s1398_s30, %s19_s30  }
   0x2   : > { %p287_p1 = scmp.lt.s32.totalorder %s1336_s30, 3 }
   0x4   : > { %p288_p2 = pnand %p1234_p0, %p287_p1 }
   0x5   : > { %p323_p3 = scmp.lt.s32.totalorder (!%p288_p2), %s1230_s10, 1  ;;  %s1339_s15 = smov (!%p288_p2), 111  }
   0x6   : > { %291 = sbr.rel (%p288_p2) target bundleno = 2074 (0x81a), region = 56  ;;  %s1340_s16 = smov (!%p288_p2), 113  }
   0x7   : > { %s1341_s17 = smov (!%p288_p2), 112   ;;  %s1342_s18 = smov (!%p288_p2), 127  }
   0x8   : > { %s1343_s19 = smov (!%p288_p2), 1   ;;  %s1344_s20 = smov (!%p288_p2), 15  }
   0x9   : > { %s1345_s21 = smov (!%p288_p2), 16   ;;  %s1347_s22 = smov (!%p288_p2), 17  }
   0xb   : > { %vm336_vm0 = vcmask 138240   ;;  %v1338_v0 = vmov 0.0   ;;  %s1816_s10 = smov (!%p323_p3, %s1230_s10), 1  ;;  %v1346_v6 = vmov 0   ;;  %v491_v7 = vld [vmem:[%s1799_s2] sm:$0xff]  ;;  %v344_v8 = vlaneseq }
   0xc   : > { %337 = vst.msk [vmem:[#allocation2 + $0x18] sm:$0xff] %vm336_vm0, %v1338_v0  ;;  %334 = vst [vmem:[#allocation2 + $0x8] sm:$0xff] %v1338_v0  ;;  %565 = vmatprep.mubr.f32.mxu0 %v1338_v0  ;;  %750 = vmatprep.mubr.f32.mxu1 %v1338_v0  ;;  %s1295_s11 = sshll.u32 %s1816_s10, 3  ;;  %vm461_vm1 = vcmask 908288   ;;  %vm485_vm4 = vcmask 916480   ;;  %vm448_vm5 = vcmask 924672  }
   0xd   : > { %335 = vst [vmem:[#allocation2 + $0x10] sm:$0xff] %v1338_v0  ;;  %s327_s14 = scalar_lea.vmem %s1797_s0, %s1295_s11  ;;  %1315 = vset.pattern.permute.xlu0 %v1346_v6  ;;  %1316 = vset.pattern.permute.xlu1 %v1346_v6  ;;  %v345_v9 = vand.u32 127, %v344_v8  ;;  %vm435_vm8 = vcmask 1039360   ;;  %vm420_vm9 = vcmask 7168   ;;  %vm407_vm10 = vcmask 121856   ;;  %v490_v56 = vld [vmem:[%s1798_s1] sm:$0xff] }
   0xe   : > { %v338_v1 = vld [vmem:[%s327_s14] sm:$0xff]  ;;  %vm474_vm11 = vcmask 130048   ;;  %vm497_vm12 = vcmask 588800  }
   0xf   : > { %342 = vst [vmem:[#allocation2 + $0x8] sm:$0xf] %v338_v1  ;;  %v340_v3 = vcombine.high %v338_v1, %v338_v1  ;;  %v346_v12 = vadd.s32 128, %v345_v9  ;;  %v351_v17 = vand.u32 15, %v345_v9  ;;  %v1077_v21 = vld [vmem:[%s1804_s7] sm:$0x7] }
  0x11   : > { %343 = vst [vmem:[#allocation2 + $0x10] sm:$0xf] %v340_v3  ;;  %v358_v15 = vand.u32 15, %v346_v12  ;;  %vm1493_vm3 = vcmp.ne.s32.totalorder %v351_v17, 15  ;;  %vm1511_vm7 = vcmp.ne.s32.totalorder %v351_v17, 0  ;;  %v677_v3 = vld [vmem:[%s1801_s4] sm:$0xff] }
  0x13   : > { %v1420_v2 = vld [vmem:[#allocation2 + $0x18] sm:$0xff]  ;;  %vm1489_vm2 = vcmp.ne.s32.totalorder %v358_v15, 15  ;;  %vm1505_vm6 = vcmp.ne.s32.totalorder %v358_v15, 0 }
  0x14   : > { %459 = vrot.lane.b32.xlu0 %v1420_v2, %s1339_s15  ;;  %446 = vrot.lane.b32.xlu1 %v1420_v2, %s1340_s16 }
  0x16   : > { %v1428_v4 = vld [vmem:[#allocation2 + $0x8] sm:$0xff] }
  0x18   : > { %483 = vrot.lane.b32.xlu0 %v1420_v2, %s1341_s17  ;;  %455 = vrot.lane.b32.xlu1 %v1428_v4, %s1339_s15  ;;  %v1434_v5 = vld [vmem:[#allocation2 + $0x10] sm:$0xff] }
  0x1c   : > { %442 = vrot.lane.b32.xlu0 %v1428_v4, %s1340_s16  ;;  %479 = vrot.lane.b32.xlu1 %v1428_v4, %s1341_s17 }
  0x20   : > { %457 = vrot.lane.b32.xlu0 %v1434_v5, %s1339_s15  ;;  %481 = vrot.lane.b32.xlu1 %v1434_v5, %s1341_s17 }
  0x24   : > { %444 = vrot.lane.b32.xlu0 %v1434_v5, %s1340_s16  ;;  %431 = vrot.lane.b32.xlu1 %v1434_v5, %s1342_s18 }
  0x28   : > { %433 = vrot.lane.b32.xlu0 %v1420_v2, %s1342_s18  ;;  %429 = vrot.lane.b32.xlu1 %v1428_v4, %s1342_s18 }
  0x2c   : > { %416 = vrot.lane.b32.xlu0 %v1428_v4, %s1343_s19  ;;  %418 = vrot.lane.b32.xlu1 %v1434_v5, %s1343_s19 }
  0x30   : > { %414 = vrot.lane.b32.xlu0 %v1338_v0, %s1343_s19  ;;  %403 = vrot.lane.b32.xlu1 %v1428_v4, %s1344_s20 }
  0x34   : > { %405 = vrot.lane.b32.xlu0 %v1434_v5, %s1344_s20  ;;  %401 = vrot.lane.b32.xlu1 %v1338_v0, %s1344_s20 }
  0x38   : > { %470 = vrot.lane.b32.xlu0 %v1428_v4, %s1345_s21  ;;  %472 = vrot.lane.b32.xlu1 %v1434_v5, %s1345_s21 }
  0x3c   : > { %468 = vrot.lane.b32.xlu0 %v1338_v0, %s1345_s21  ;;  %387 = vrot.lane.b32.xlu1 %v1428_v4, %s1347_s22 }
  0x40   : > { %389 = vrot.lane.b32.xlu0 %v1434_v5, %s1347_s22  ;;  %385 = vrot.lane.b32.xlu1 %v1338_v0, %s1347_s22 }
  0x44   : > { %494 = vperm.xlu0 %1315, %v491_v7   ;;  %648 = vrot.lane.b32.xlu1 %v1420_v2, %s1339_s15 }
  0x48   : > { %670 = vrot.lane.b32.xlu0 %v1420_v2, %s1341_s17  ;;  %636 = vrot.lane.b32.xlu1 %v1420_v2, %s1340_s16 }
  0x4c   : > { %624 = vrot.lane.b32.xlu0 %v1420_v2, %s1342_s18  ;;  %594 = vrot.lane.b32.xlu1 %v1338_v0, %s1344_s20 }
  0x50   : > { %606 = vrot.lane.b32.xlu0 %v1338_v0, %s1343_s19 }
  0x86   : > { %v460_v10 = vpop.permute.xlu0 %459  ;;  %v447_v11 = vpop.permute.xlu1 %446 }
  0x8a   : > { %v484_v13 = vpop.permute.xlu0 %483  ;;  %v456_v14 = vpop.permute.xlu1 %455 }
  0x8e   : > { %v443_v16 = vpop.permute.xlu0 %442  ;;  %v480_v18 = vpop.permute.xlu1 %479 }
  0x92   : > { %v458_v20 = vpop.permute.xlu0 %457  ;;  %v482_v24 = vpop.permute.xlu1 %481 }
  0x93   : > { %v463_v22 = vsel %vm461_vm1, %v458_v20, %v460_v10  ;;  %v462_v23 = vsel %vm461_vm1, %v456_v14, %v458_v20  ;;  %v487_v25 = vsel %vm485_vm4, %v482_v24, %v484_v13  ;;  %v486_v27 = vsel %vm485_vm4, %v480_v18, %v482_v24 }
  0x94   : > { %1239 = vmatprep.subr.msk.mxu0 %vm1489_vm2, %v463_v22 }
  0x95   : > { %1240 = vmatpush1.msk.msra.mxu0 %vm1493_vm3, %v462_v23 }
  0x96   : > { %v445_v26 = vpop.permute.xlu0 %444  ;;  %517 = vmatprep.subr.mxu0 %v487_v25  ;;  %v432_v32 = vpop.permute.xlu1 %431 }
  0x97   : > { %v449_v29 = vsel %vm448_vm5, %v443_v16, %v445_v26  ;;  %v450_v30 = vsel %vm448_vm5, %v445_v26, %v447_v11  ;;  %518 = vmatpush1.msra.mxu0 %v486_v27 }
  0x98   : > { %1241 = vmatprep.subr.msk.mxu0 %vm1505_vm6, %v450_v30 }
  0x99   : > { %1242 = vmatpush1.msk.msra.mxu0 %vm1511_vm7, %v449_v29 }
  0x9a   : > { %v434_v33 = vpop.permute.xlu0 %433  ;;  %v430_v35 = vpop.permute.xlu1 %429 }
  0x9b   : > { %v437_v34 = vsel %vm435_vm8, %v432_v32, %v434_v33  ;;  %v436_v36 = vsel %vm435_vm8, %v430_v35, %v432_v32 }
  0x9c   : > { %1243 = vmatprep.subr.msk.mxu0 %vm1489_vm2, %v437_v34 }
  0x9d   : > { %1244 = vmatpush1.msk.msra.mxu0 %vm1493_vm3, %v436_v36 }
  0x9e   : > { %v417_v37 = vpop.permute.xlu0 %416  ;;  %523 = vmatprep.subr.mxu0 %v1434_v5  ;;  %v419_v38 = vpop.permute.xlu1 %418 }
  0x9f   : > { %524 = vmatpush1.msra.mxu0 %v1428_v4  ;;  %v422_v39 = vsel %vm420_vm9, %v417_v37, %v419_v38 }
  0xa0   : > { %1245 = vmatprep.subr.msk.mxu0 %vm1505_vm6, %v422_v39 }
  0xa2   : > { %v415_v40 = vpop.permute.xlu0 %414  ;;  %v404_v42 = vpop.permute.xlu1 %403 }
  0xa3   : > { %v421_v41 = vsel %vm420_vm9, %v415_v40, %v417_v37 }
  0xa4   : > { %1246 = vmatpush1.msk.msra.mxu0 %vm1511_vm7, %v421_v41 }
  0xa6   : > { %v406_v43 = vpop.permute.xlu0 %405  ;;  %v402_v45 = vpop.permute.xlu1 %401 }
  0xa7   : > { %v409_v44 = vsel %vm407_vm10, %v404_v42, %v406_v43  ;;  %v408_v46 = vsel %vm407_vm10, %v402_v45, %v404_v42 }
  0xa8   : > { %1247 = vmatprep.subr.msk.mxu0 %vm1489_vm2, %v409_v44 }
  0xa9   : > { %1248 = vmatpush1.msk.msra.mxu0 %vm1493_vm3, %v408_v46 }
  0xaa   : > { %v471_v47 = vpop.permute.xlu0 %470  ;;  %v473_v48 = vpop.permute.xlu1 %472 }
  0xab   : > { %v476_v49 = vsel %vm474_vm11, %v471_v47, %v473_v48 }
  0xac   : > { %529 = vmatprep.subr.mxu0 %v476_v49 }
  0xae   : > { %v469_v50 = vpop.permute.xlu0 %468  ;;  %v388_v52 = vpop.permute.xlu1 %387 }
  0xaf   : > { %v475_v51 = vsel %vm474_vm11, %v469_v50, %v471_v47  ;;  %v676_v47 = vld [vmem:[%s1800_s3] sm:$0xff] }
  0xb0   : > { %530 = vmatpush1.msra.mxu0 %v475_v51 }
  0xb2   : > { %v390_v53 = vpop.permute.xlu0 %389  ;;  %v386_v55 = vpop.permute.xlu1 %385 }
  0xb3   : > { %v392_v54 = vsel %vm336_vm0, %v388_v52, %v390_v53  ;;  %v391_v57 = vsel %vm336_vm0, %v386_v55, %v388_v52 }
  0xb4   : > { %1249 = vmatprep.subr.msk.mxu0 %vm1505_vm6, %v392_v54 }
  0xb5   : > { %1250 = vmatpush1.msk.msra.mxu0 %vm1511_vm7, %v391_v57 }
  0xb6   : > { %1251 = vmatmul.mubr.msk.f32.vlgmr.msra.gmra.mxu0 %vm497_vm12, %v490_v56  ;;  %v649_v4 = vpop.permute.xlu1 %648 }
  0xb7   : > { %952 = vmatprep.mubr.f32.mxu0 %v1338_v0 }
  0xba   : > { %v637_v6 = vpop.permute.xlu1 %636 }
  0xbe   : > { %v595_v8 = vpop.permute.xlu1 %594 }
  0xbf   : > { %v495_v58 = vpop.permute.xlu0 %494 }
  0xc3   : > { %v671_v5 = vpop.permute.xlu0 %670 }
  0xc7   : > { %v625_v7 = vpop.permute.xlu0 %624 }
  0xcb   : > { %v607_v9 = vpop.permute.xlu0 %606 }
 0x176   : > { %v567_v59 = vpop.f32.mrf.mxu0 }
 0x177   : > { %v568_v60 = vadd.f32 %v567_v59, %v495_v58 }
 0x178   : > { %v569_v62 = vpop.f32.mrf.mxu0 }
 0x179   : > { %v1552_v61 = vmax.f32 %v568_v60, 0.0  ;;  %v570_v63 = vadd.f32 %v569_v62, %v495_v58 }
 0x17b   : > { %666 = vrot.lane.b32.xlu1 %v1552_v61, %s1341_s17  ;;  %644 = vrot.lane.b32.xlu0 %v1552_v61, %s1339_s15  ;;  %v573_v1 = vmax.f32 %v570_v63, 0.0 }
 0x17f   : > { %620 = vrot.lane.b32.xlu1 %v1552_v61, %s1342_s18  ;;  %632 = vrot.lane.b32.xlu0 %v1552_v61, %s1340_s16 }
 0x183   : > { %596 = vrot.lane.b32.xlu1 %v1552_v61, %s1344_s20  ;;  %608 = vrot.lane.b32.xlu0 %v1552_v61, %s1343_s19 }
 0x187   : > { %646 = vrot.lane.b32.xlu1 %v573_v1, %s1339_s15  ;;  %658 = vrot.lane.b32.xlu0 %v1552_v61, %s1345_s21 }
 0x18b   : > { %668 = vrot.lane.b32.xlu1 %v573_v1, %s1341_s17  ;;  %634 = vrot.lane.b32.xlu0 %v573_v1, %s1340_s16 }
 0x18f   : > { %584 = vrot.lane.b32.xlu1 %v1552_v61, %s1347_s22  ;;  %656 = vrot.lane.b32.xlu0 %v1338_v0, %s1345_s21 }
 0x193   : > { %622 = vrot.lane.b32.xlu1 %v573_v1, %s1342_s18  ;;  %598 = vrot.lane.b32.xlu0 %v573_v1, %s1344_s20 }
 0x197   : > { %610 = vrot.lane.b32.xlu1 %v573_v1, %s1343_s19  ;;  %586 = vrot.lane.b32.xlu0 %v573_v1, %s1347_s22 }
 0x19b   : > { %660 = vrot.lane.b32.xlu1 %v573_v1, %s1345_s21  ;;  %680 = vperm.xlu0 %1315, %v677_v3  }
 0x19f   : > { %582 = vrot.lane.b32.xlu1 %v1338_v0, %s1347_s22 }
 0x1ed   : > { %v667_v10 = vpop.permute.xlu1 %666  ;;  %v645_v11 = vpop.permute.xlu0 %644 }
 0x1f1   : > { %v621_v12 = vpop.permute.xlu1 %620  ;;  %v633_v13 = vpop.permute.xlu0 %632 }
 0x1f5   : > { %v597_v14 = vpop.permute.xlu1 %596  ;;  %v609_v15 = vpop.permute.xlu0 %608 }
 0x1f6   : > { %v612_v38 = vsel %vm420_vm9, %v607_v9, %v609_v15  ;;  %v600_v40 = vsel %vm407_vm10, %v595_v8, %v597_v14  ;;  %v879_v8 = vld [vmem:[%s1803_s6] sm:$0xff] }
 0x1f9   : > { %v647_v16 = vpop.permute.xlu1 %646  ;;  %v659_v17 = vpop.permute.xlu0 %658 }
 0x1fa   : > { %v651_v18 = vsel %vm461_vm1, %v647_v16, %v649_v4  ;;  %v650_v20 = vsel %vm461_vm1, %v645_v11, %v647_v16 }
 0x1fb   : > { %1252 = vmatprep.subr.msk.mxu1 %vm1489_vm2, %v651_v18 }
 0x1fc   : > { %1253 = vmatpush1.msk.msra.mxu1 %vm1493_vm3, %v650_v20 }
 0x1fd   : > { %v669_v22 = vpop.permute.xlu1 %668  ;;  %v635_v23 = vpop.permute.xlu0 %634 }
 0x1fe   : > { %v673_v24 = vsel %vm485_vm4, %v669_v22, %v671_v5  ;;  %v672_v25 = vsel %vm485_vm4, %v667_v10, %v669_v22  ;;  %v639_v26 = vsel %vm448_vm5, %v635_v23, %v637_v6  ;;  %v638_v27 = vsel %vm448_vm5, %v633_v13, %v635_v23 }
 0x1ff   : > { %702 = vmatprep.subr.mxu1 %v673_v24 }
 0x200   : > { %703 = vmatpush1.msra.mxu1 %v672_v25 }
 0x201   : > { %v585_v29 = vpop.permute.xlu1 %584  ;;  %1254 = vmatprep.subr.msk.mxu1 %vm1505_vm6, %v639_v26  ;;  %v657_v30 = vpop.permute.xlu0 %656 }
 0x202   : > { %1255 = vmatpush1.msk.msra.mxu1 %vm1511_vm7, %v638_v27  ;;  %v662_v44 = vsel %vm474_vm11, %v657_v30, %v659_v17 }
 0x205   : > { %v623_v32 = vpop.permute.xlu1 %622  ;;  %v599_v35 = vpop.permute.xlu0 %598 }
 0x206   : > { %v626_v33 = vsel %vm435_vm8, %v621_v12, %v623_v32  ;;  %v627_v34 = vsel %vm435_vm8, %v623_v32, %v625_v7  ;;  %v601_v39 = vsel %vm407_vm10, %v597_v14, %v599_v35 }
 0x207   : > { %1256 = vmatprep.subr.msk.mxu1 %vm1489_vm2, %v627_v34 }
 0x208   : > { %1257 = vmatpush1.msk.msra.mxu1 %vm1493_vm3, %v626_v33 }
 0x209   : > { %v611_v36 = vpop.permute.xlu1 %610  ;;  %708 = vmatprep.subr.mxu1 %v573_v1  ;;  %v587_v41 = vpop.permute.xlu0 %586 }
 0x20a   : > { %v613_v37 = vsel %vm420_vm9, %v609_v15, %v611_v36  ;;  %709 = vmatpush1.msra.mxu1 %v1552_v61  ;;  %v589_v45 = vsel %vm336_vm0, %v585_v29, %v587_v41 }
 0x20b   : > { %1258 = vmatprep.subr.msk.mxu1 %vm1505_vm6, %v613_v37 }
 0x20c   : > { %1259 = vmatpush1.msk.msra.mxu1 %vm1511_vm7, %v612_v38 }
 0x20d   : > { %v661_v42 = vpop.permute.xlu1 %660  ;;  %1260 = vmatprep.subr.msk.mxu1 %vm1489_vm2, %v601_v39 }
 0x20e   : > { %1261 = vmatpush1.msk.msra.mxu1 %vm1493_vm3, %v600_v40  ;;  %v663_v43 = vsel %vm474_vm11, %v659_v17, %v661_v42 }
 0x20f   : > { %714 = vmatprep.subr.mxu1 %v663_v43 }
 0x210   : > { %715 = vmatpush1.msra.mxu1 %v662_v44 }
 0x211   : > { %v583_v46 = vpop.permute.xlu1 %582  ;;  %1262 = vmatprep.subr.msk.mxu1 %vm1505_vm6, %v589_v45 }
 0x212   : > { %v588_v48 = vsel %vm336_vm0, %v583_v46, %v585_v29 }
 0x213   : > { %1263 = vmatpush1.msk.msra.mxu1 %vm1511_vm7, %v588_v48 }
 0x214   : > { %1264 = vmatmul.mubr.msk.f32.vlgmr.msra.gmra.mxu1 %vm497_vm12, %v676_v47 }
 0x215   : > { %1151 = vmatprep.mubr.f32.mxu1 %v1338_v0 }
 0x216   : > { %v681_v50 = vpop.permute.xlu0 %680 }
 0x2d4   : > { %v752_v49 = vpop.f32.mrf.mxu1 }
 0x2d5   : > { %v753_v52 = vadd.f32 %v752_v49, %v681_v50 }
 0x2d6   : > { %v754_v51 = vpop.f32.mrf.mxu1 }
 0x2d7   : > { %v755_v53 = vadd.f32 %v754_v51, %v681_v50 }
 0x2d9   : > { %v757_v54 = vadd.f32 %v755_v53, %v753_v52 }
 0x2db   : > { %758 = vadd.xlane.f32.xlu1 %v757_v54 }
 0x2ec   : > { %850 = vrot.lane.b32.xlu1 %v1420_v2, %s1339_s15 }
 0x2f0   : > { %872 = vrot.lane.b32.xlu1 %v1420_v2, %s1341_s17 }
 0x2f4   : > { %826 = vrot.lane.b32.xlu1 %v1420_v2, %s1342_s18 }
 0x2f8   : > { %808 = vrot.lane.b32.xlu1 %v1338_v0, %s1343_s19 }
 0x2fc   : > { %858 = vrot.lane.b32.xlu1 %v1338_v0, %s1345_s21 }
 0x364   : > { %v759_v55 = vpop.xlane.xlu1 %758 }
 0x365   : > { %v761_v56 = vmul.f32 0.00390625, %v759_v55 }
 0x367   : > { %v762_v57 = vsub.f32 %v753_v52, %v761_v56  ;;  %v763_v58 = vsub.f32 %v755_v53, %v761_v56  ;;  %v878_v52 = vld [vmem:[%s1802_s5] sm:$0xff] }
 0x368   : > { %v851_v9 = vpop.permute.xlu1 %850 }
 0x369   : > { %v764_v59 = vmul.f32 %v762_v57, %v762_v57  ;;  %v765_v60 = vmul.f32 %v763_v58, %v763_v58 }
 0x36b   : > { %v766_v61 = vadd.f32 %v765_v60, %v764_v59 }
 0x36c   : > { %v873_v10 = vpop.permute.xlu1 %872 }
 0x36d   : > { %767 = vadd.xlane.f32.xlu0 %v766_v61 }
 0x370   : > { %v827_v11 = vpop.permute.xlu1 %826 }
 0x374   : > { %v809_v13 = vpop.permute.xlu1 %808 }
 0x378   : > { %v859_v15 = vpop.permute.xlu1 %858 }
 0x383   : > { %838 = vrot.lane.b32.xlu0 %v1420_v2, %s1340_s16 }
 0x387   : > { %796 = vrot.lane.b32.xlu0 %v1338_v0, %s1344_s20 }
 0x3f6   : > { %v768_v62 = vpop.xlane.xlu0 %767 }
 0x3f7   : > { %v769_v63 = vmul.f32 0.00390625, %v768_v62 }
 0x3f9   : > { %v770_v1 = vadd.f32 1e-05, %v769_v63 }
 0x3fa   : > { %v839_v12 = vpop.permute.xlu0 %838 }
 0x3fb   : > { %1318 = vrsqrt.f32 %v770_v1 }
 0x3fe   : > { %v797_v14 = vpop.permute.xlu0 %796 }
 0x408   : > { %v1319_v3 = vpop.eup %1318 }
 0x409   : > { %v772_v4 = vmul.f32 %v1319_v3, %v762_v57  ;;  %v773_v5 = vmul.f32 %v1319_v3, %v763_v58 }
 0x40b   : > { %v774_v6 = vmax.f32 %v772_v4, 0.0  ;;  %v775_v7 = vmax.f32 %v773_v5, 0.0 }
 0x40d   : > { %848 = vrot.lane.b32.xlu0 %v775_v7, %s1339_s15  ;;  %846 = vrot.lane.b32.xlu1 %v774_v6, %s1339_s15 }
 0x411   : > { %870 = vrot.lane.b32.xlu0 %v775_v7, %s1341_s17  ;;  %836 = vrot.lane.b32.xlu1 %v775_v7, %s1340_s16 }
 0x415   : > { %868 = vrot.lane.b32.xlu0 %v774_v6, %s1341_s17  ;;  %834 = vrot.lane.b32.xlu1 %v774_v6, %s1340_s16 }
 0x419   : > { %824 = vrot.lane.b32.xlu0 %v775_v7, %s1342_s18  ;;  %810 = vrot.lane.b32.xlu1 %v774_v6, %s1343_s19 }
 0x41d   : > { %822 = vrot.lane.b32.xlu0 %v774_v6, %s1342_s18  ;;  %800 = vrot.lane.b32.xlu1 %v775_v7, %s1344_s20 }
 0x421   : > { %812 = vrot.lane.b32.xlu0 %v775_v7, %s1343_s19  ;;  %860 = vrot.lane.b32.xlu1 %v774_v6, %s1345_s21 }
 0x425   : > { %798 = vrot.lane.b32.xlu0 %v774_v6, %s1344_s20  ;;  %788 = vrot.lane.b32.xlu1 %v775_v7, %s1347_s22 }
 0x429   : > { %862 = vrot.lane.b32.xlu0 %v775_v7, %s1345_s21  ;;  %882 = vperm.xlu1 %1316, %v879_v8  }
 0x42d   : > { %786 = vrot.lane.b32.xlu0 %v774_v6, %s1347_s22 }
 0x431   : > { %784 = vrot.lane.b32.xlu0 %v1338_v0, %s1347_s22 }
 0x47f   : > { %v849_v16 = vpop.permute.xlu0 %848  ;;  %v847_v17 = vpop.permute.xlu1 %846 }
 0x480   : > { %v853_v18 = vsel %vm461_vm1, %v849_v16, %v851_v9  ;;  %v852_v20 = vsel %vm461_vm1, %v847_v17, %v849_v16 }
 0x481   : > { %1265 = vmatprep.subr.msk.mxu0 %vm1489_vm2, %v853_v18 }
 0x482   : > { %1266 = vmatpush1.msk.msra.mxu0 %vm1493_vm3, %v852_v20 }
 0x483   : > { %v871_v22 = vpop.permute.xlu0 %870  ;;  %v837_v23 = vpop.permute.xlu1 %836 }
 0x484   : > { %v875_v24 = vsel %vm485_vm4, %v871_v22, %v873_v10  ;;  %v841_v29 = vsel %vm448_vm5, %v837_v23, %v839_v12 }
 0x485   : > { %904 = vmatprep.subr.mxu0 %v875_v24 }
 0x487   : > { %v869_v25 = vpop.permute.xlu0 %868  ;;  %v835_v26 = vpop.permute.xlu1 %834 }
 0x488   : > { %v874_v27 = vsel %vm485_vm4, %v869_v25, %v871_v22  ;;  %v840_v30 = vsel %vm448_vm5, %v835_v26, %v837_v23 }
 0x489   : > { %905 = vmatpush1.msra.mxu0 %v874_v27 }
 0x48a   : > { %1267 = vmatprep.subr.msk.mxu0 %vm1505_vm6, %v841_v29 }
 0x48b   : > { %v825_v32 = vpop.permute.xlu0 %824  ;;  %1268 = vmatpush1.msk.msra.mxu0 %vm1511_vm7, %v840_v30  ;;  %v811_v34 = vpop.permute.xlu1 %810 }
 0x48c   : > { %v829_v33 = vsel %vm435_vm8, %v825_v32, %v827_v11  ;;  %v814_v40 = vsel %vm420_vm9, %v809_v13, %v811_v34 }
 0x48d   : > { %1269 = vmatprep.subr.msk.mxu0 %vm1489_vm2, %v829_v33 }
 0x48f   : > { %v823_v35 = vpop.permute.xlu0 %822  ;;  %v801_v37 = vpop.permute.xlu1 %800 }
 0x490   : > { %v828_v36 = vsel %vm435_vm8, %v823_v35, %v825_v32 }
 0x491   : > { %1270 = vmatpush1.msk.msra.mxu0 %vm1493_vm3, %v828_v36 }
 0x492   : > { %910 = vmatprep.subr.mxu0 %v775_v7 }
 0x493   : > { %v813_v38 = vpop.permute.xlu0 %812  ;;  %911 = vmatpush1.msra.mxu0 %v774_v6  ;;  %v861_v44 = vpop.permute.xlu1 %860 }
 0x494   : > { %v815_v39 = vsel %vm420_vm9, %v811_v34, %v813_v38  ;;  %v864_v47 = vsel %vm474_vm11, %v859_v15, %v861_v44 }
 0x495   : > { %1271 = vmatprep.subr.msk.mxu0 %vm1505_vm6, %v815_v39 }
 0x496   : > { %1272 = vmatpush1.msk.msra.mxu0 %vm1511_vm7, %v814_v40 }
 0x497   : > { %v799_v41 = vpop.permute.xlu0 %798  ;;  %v789_v48 = vpop.permute.xlu1 %788 }
 0x498   : > { %v802_v42 = vsel %vm407_vm10, %v797_v14, %v799_v41  ;;  %v803_v43 = vsel %vm407_vm10, %v799_v41, %v801_v37 }
 0x499   : > { %1273 = vmatprep.subr.msk.mxu0 %vm1489_vm2, %v803_v43 }
 0x49a   : > { %1274 = vmatpush1.msk.msra.mxu0 %vm1493_vm3, %v802_v42 }
 0x49b   : > { %v863_v45 = vpop.permute.xlu0 %862 }
 0x49c   : > { %v865_v46 = vsel %vm474_vm11, %v861_v44, %v863_v45 }
 0x49d   : > { %916 = vmatprep.subr.mxu0 %v865_v46 }
 0x49e   : > { %917 = vmatpush1.msra.mxu0 %v864_v47 }
 0x49f   : > { %v787_v49 = vpop.permute.xlu0 %786 }
 0x4a0   : > { %v791_v50 = vsel %vm336_vm0, %v787_v49, %v789_v48 }
 0x4a1   : > { %1275 = vmatprep.subr.msk.mxu0 %vm1505_vm6, %v791_v50 }
 0x4a3   : > { %v785_v51 = vpop.permute.xlu0 %784 }
 0x4a4   : > { %v790_v53 = vsel %vm336_vm0, %v785_v51, %v787_v49  ;;  %v883_v55 = vpop.permute.xlu1 %882 }
 0x4a5   : > { %1276 = vmatpush1.msk.msra.mxu0 %vm1511_vm7, %v790_v53 }
 0x4a6   : > { %1277 = vmatmul.mubr.msk.f32.vlgmr.msra.gmra.mxu0 %vm497_vm12, %v878_v52 }
 0x566   : > { %v954_v54 = vpop.f32.mrf.mxu0 }
 0x567   : > { %v955_v57 = vadd.f32 %v954_v54, %v883_v55 }
 0x568   : > { %v956_v56 = vpop.f32.mrf.mxu0 }
 0x569   : > { %v957_v58 = vadd.f32 %v956_v56, %v883_v55 }
 0x56b   : > { %v959_v59 = vadd.f32 %v957_v58, %v955_v57 }
 0x56d   : > { %960 = vadd.xlane.f32.xlu0 %v959_v59 }
 0x583   : > { %1071 = vrot.lane.b32.xlu0 %v1420_v2, %s1341_s17 }
 0x587   : > { %1025 = vrot.lane.b32.xlu0 %v1420_v2, %s1342_s18 }
 0x58b   : > { %1007 = vrot.lane.b32.xlu0 %v1338_v0, %s1343_s19 }
 0x58f   : > { %1057 = vrot.lane.b32.xlu0 %v1338_v0, %s1345_s21 }
 0x5f6   : > { %v961_v60 = vpop.xlane.xlu0 %960 }
 0x5f7   : > { %v962_v61 = vmul.f32 0.00390625, %v961_v60 }
 0x5f9   : > { %v963_v62 = vsub.f32 %v955_v57, %v962_v61  ;;  %v964_v63 = vsub.f32 %v957_v58, %v962_v61 }
 0x5fa   : > { %v1072_v11 = vpop.permute.xlu0 %1071 }
 0x5fb   : > { %v965_v1 = vmul.f32 %v963_v62, %v963_v62  ;;  %v966_v3 = vmul.f32 %v964_v63, %v964_v63 }
 0x5fd   : > { %v967_v4 = vadd.f32 %v966_v3, %v965_v1 }
 0x5fe   : > { %v1026_v13 = vpop.permute.xlu0 %1025 }
 0x5ff   : > { %968 = vadd.xlane.f32.xlu1 %v967_v4 }
 0x602   : > { %v1008_v15 = vpop.permute.xlu0 %1007 }
 0x606   : > { %v1058_v17 = vpop.permute.xlu0 %1057 }
 0x610   : > { %1049 = vrot.lane.b32.xlu1 %v1420_v2, %s1339_s15 }
 0x614   : > { %1037 = vrot.lane.b32.xlu1 %v1420_v2, %s1340_s16  ;;  %v1078_v2 = vld [vmem:[%s1805_s8] sm:$0x7] }
 0x618   : > { %995 = vrot.lane.b32.xlu1 %v1338_v0, %s1344_s20 }
 0x688   : > { %v969_v5 = vpop.xlane.xlu1 %968 }
 0x689   : > { %v970_v6 = vmul.f32 0.00390625, %v969_v5 }
 0x68b   : > { %v971_v7 = vadd.f32 1e-05, %v970_v6 }
 0x68c   : > { %v1050_v12 = vpop.permute.xlu1 %1049 }
 0x68d   : > { %1320 = vrsqrt.f32 %v971_v7 }
 0x690   : > { %v1038_v14 = vpop.permute.xlu1 %1037 }
 0x694   : > { %v996_v16 = vpop.permute.xlu1 %995 }
 0x69a   : > { %v1321_v8 = vpop.eup %1320 }
 0x69b   : > { %v973_v9 = vmul.f32 %v1321_v8, %v963_v62  ;;  %v974_v10 = vmul.f32 %v1321_v8, %v964_v63 }
 0x69d   : > { %975 = vst [vmem:[#allocation2 + $0x8] sm:$0xff] %v973_v9  ;;  %976 = vst [vmem:[#allocation2 + $0x10] sm:$0xff] %v974_v10  ;;  %1069 = vrot.lane.b32.xlu1 %v974_v10, %s1341_s17  ;;  %1047 = vrot.lane.b32.xlu0 %v974_v10, %s1339_s15 }
 0x6a1   : > { %1067 = vrot.lane.b32.xlu1 %v973_v9, %s1341_s17  ;;  %1045 = vrot.lane.b32.xlu0 %v973_v9, %s1339_s15 }
 0x6a5   : > { %1023 = vrot.lane.b32.xlu1 %v974_v10, %s1342_s18  ;;  %1035 = vrot.lane.b32.xlu0 %v974_v10, %s1340_s16 }
 0x6a9   : > { %1021 = vrot.lane.b32.xlu1 %v973_v9, %s1342_s18  ;;  %1033 = vrot.lane.b32.xlu0 %v973_v9, %s1340_s16 }
 0x6ad   : > { %1011 = vrot.lane.b32.xlu1 %v974_v10, %s1343_s19  ;;  %1009 = vrot.lane.b32.xlu0 %v973_v9, %s1343_s19 }
 0x6b1   : > { %997 = vrot.lane.b32.xlu1 %v973_v9, %s1344_s20  ;;  %999 = vrot.lane.b32.xlu0 %v974_v10, %s1344_s20 }
 0x6b5   : > { %1061 = vrot.lane.b32.xlu1 %v974_v10, %s1345_s21  ;;  %1059 = vrot.lane.b32.xlu0 %v973_v9, %s1345_s21  ;;  %s332_s21 = scalar_lea.vmem %s1806_s9, %s1295_s11 }
 0x6b9   : > { %985 = vrot.lane.b32.xlu1 %v973_v9, %s1347_s22  ;;  %987 = vrot.lane.b32.xlu0 %v974_v10, %s1347_s22 }
 0x6bd   : > { %983 = vrot.lane.b32.xlu1 %v1338_v0, %s1347_s22  ;;  %1081 = vperm.xlu0 %1315, %v1078_v2  }
 0x70f   : > { %v1070_v18 = vpop.permute.xlu1 %1069  ;;  %v1048_v20 = vpop.permute.xlu0 %1047 }
 0x710   : > { %v1052_v22 = vsel %vm461_vm1, %v1048_v20, %v1050_v12  ;;  %v1074_v0 = vsel %vm485_vm4, %v1070_v18, %v1072_v11 }
 0x711   : > { %1278 = vmatprep.subr.msk.mxu1 %vm1489_vm2, %v1052_v22 }
 0x713   : > { %v1068_v23 = vpop.permute.xlu1 %1067  ;;  %v1046_v24 = vpop.permute.xlu0 %1045 }
 0x714   : > { %v1051_v25 = vsel %vm461_vm1, %v1046_v24, %v1048_v20  ;;  %v1073_v26 = vsel %vm485_vm4, %v1068_v23, %v1070_v18 }
 0x715   : > { %1279 = vmatpush1.msk.msra.mxu1 %vm1493_vm3, %v1051_v25 }
 0x716   : > { %1103 = vmatprep.subr.mxu1 %v1074_v0 }
 0x717   : > { %v1024_v27 = vpop.permute.xlu1 %1023  ;;  %1104 = vmatpush1.msra.mxu1 %v1073_v26  ;;  %v1036_v29 = vpop.permute.xlu0 %1035 }
 0x718   : > { %v1040_v30 = vsel %vm448_vm5, %v1036_v29, %v1038_v14  ;;  %v1028_v35 = vsel %vm435_vm8, %v1024_v27, %v1026_v13 }
 0x719   : > { %1280 = vmatprep.subr.msk.mxu1 %vm1505_vm6, %v1040_v30 }
 0x71b   : > { %v1022_v32 = vpop.permute.xlu1 %1021  ;;  %v1034_v33 = vpop.permute.xlu0 %1033 }
 0x71c   : > { %v1039_v34 = vsel %vm448_vm5, %v1034_v33, %v1036_v29  ;;  %v1027_v36 = vsel %vm435_vm8, %v1022_v32, %v1024_v27 }
 0x71d   : > { %1281 = vmatpush1.msk.msra.mxu1 %vm1511_vm7, %v1039_v34 }
 0x71e   : > { %1282 = vmatprep.subr.msk.mxu1 %vm1489_vm2, %v1028_v35 }
 0x71f   : > { %v1012_v37 = vpop.permute.xlu1 %1011  ;;  %1283 = vmatpush1.msk.msra.mxu1 %vm1493_vm3, %v1027_v36  ;;  %v1010_v38 = vpop.permute.xlu0 %1009 }
 0x720   : > { %v1014_v39 = vsel %vm420_vm9, %v1010_v38, %v1012_v37  ;;  %1109 = vmatprep.subr.mxu1 %v974_v10  ;;  %v1013_v40 = vsel %vm420_vm9, %v1008_v15, %v1010_v38 }
 0x721   : > { %1110 = vmatpush1.msra.mxu1 %v973_v9 }
 0x722   : > { %1284 = vmatprep.subr.msk.mxu1 %vm1505_vm6, %v1014_v39 }
 0x723   : > { %v998_v41 = vpop.permute.xlu1 %997  ;;  %1285 = vmatpush1.msk.msra.mxu1 %vm1511_vm7, %v1013_v40  ;;  %v1000_v42 = vpop.permute.xlu0 %999 }
 0x724   : > { %v1001_v43 = vsel %vm407_vm10, %v996_v16, %v998_v41  ;;  %v1002_v44 = vsel %vm407_vm10, %v998_v41, %v1000_v42 }
 0x725   : > { %1286 = vmatprep.subr.msk.mxu1 %vm1489_vm2, %v1002_v44 }
 0x726   : > { %1287 = vmatpush1.msk.msra.mxu1 %vm1493_vm3, %v1001_v43 }
 0x727   : > { %v1062_v45 = vpop.permute.xlu1 %1061  ;;  %v1060_v46 = vpop.permute.xlu0 %1059 }
 0x728   : > { %v1063_v47 = vsel %vm474_vm11, %v1058_v17, %v1060_v46  ;;  %v1064_v48 = vsel %vm474_vm11, %v1060_v46, %v1062_v45 }
 0x729   : > { %1115 = vmatprep.subr.mxu1 %v1064_v48 }
 0x72a   : > { %1116 = vmatpush1.msra.mxu1 %v1063_v47 }
 0x72b   : > { %v986_v49 = vpop.permute.xlu1 %985  ;;  %v988_v50 = vpop.permute.xlu0 %987 }
 0x72c   : > { %v990_v51 = vsel %vm336_vm0, %v986_v49, %v988_v50 }
 0x72d   : > { %1288 = vmatprep.subr.msk.mxu1 %vm1505_vm6, %v990_v51 }
 0x72f   : > { %v984_v19 = vpop.permute.xlu1 %983 }
 0x730   : > { %v989_v52 = vsel %vm336_vm0, %v984_v19, %v986_v49 }
 0x731   : > { %1289 = vmatpush1.msk.msra.mxu1 %vm1511_vm7, %v989_v52 }
 0x732   : > { %1290 = vmatmul.mubr.msk.f32.vlgmr.msra.gmra.mxu1 %vm497_vm12, %v1077_v21 }
 0x738   : > { %v1082_v53 = vpop.permute.xlu0 %1081 }
 0x7f2   : > { %v1153_v54 = vpop.f32.mrf.mxu1 }
 0x7f3   : > { %v1154_v55 = vadd.f32 %v1153_v54, %v1082_v53 }
 0x7f4   : > { %v1155_v56 = vpop.f32.mrf.mxu1 }
 0x7f5   : > { %v1291_v57 = vmul.f32 -1.442695, %v1154_v55  ;;  %v1156_v28 = vadd.f32 %v1155_v56, %v1082_v53 }
 0x7f7   : > { %1322 = vpow2.f32 %v1291_v57  ;;  %v1292_v58 = vmul.f32 -1.442695, %v1156_v28 }
 0x7f9   : > { %1324 = vpow2.f32 %v1292_v58 }
 0x804   : > { %v1323_v59 = vpop.eup %1322 }
 0x805   : > { %v1164_v60 = vadd.f32 1.0, %v1323_v59 }
 0x806   : > { %v1325_v61 = vpop.eup %1324 }
 0x807   : > { %v1165_v62 = vadd.f32 1.0, %v1325_v61  ;;  %1326 = vrcp.f32 %v1164_v60 }
 0x809   : > { %1328 = vrcp.f32 %v1165_v62 }
 0x814   : > { %v1327_v31 = vpop.eup %1326 }
 0x816   : > { %v1329_v63 = vpop.eup %1328 }
 0x817   : > { %v1172_v1 = vcombine.low %v1327_v31, %v1329_v63 }
 0x819   : > { %1174 = vst [vmem:[%s332_s21] sm:$0x77] %v1172_v1 }
 0x81a PF: > { %s19_s30 = sadd.s32 1, %s1336_s30  }
 0x81b   : > { %p16_p4 = scmp.ge.s32.totalorder %s19_s30, 4  }
 0x81d   :  { %18 = sbr.rel (!%p16_p4) target bundleno = 1 (0x1), region = 86 }

</bundles_post_ra>
